<compile_context>
chip_gen: v7x
topology: tpu7x:2x2x1
jax: 0.10.0
libtpu: 0.0.40
codegen_flags: <defaults>
</compile_context>

<pallas_src>
import jax
import jax.numpy as jnp
from jax.experimental import pallas as pl
from jax.experimental.pallas import tpu as pltpu

NEG_SLOPE = 0.01  # nn.LeakyReLU default


def _leaky_relu(x):
    # max(x, 0.01*x) == LeakyReLU(x); drops the compare of where(x>0, x, 0.01*x).
    return jnp.maximum(x, NEG_SLOPE * x)


def _round_up(x, m):
    return ((x + m - 1) // m) * m


def _pad2(a, rows, cols):
    return jnp.pad(a, ((0, rows - a.shape[0]), (0, cols - a.shape[1])))


def _default_target_rows():
    """~512 M-rows per block on v6e/v7x (2x256^2 MXU), ~256 on v5e (4x128^2 MXU)."""
    try:
        kind = jax.devices()[0].device_kind.lower()
    except Exception:
        kind = ""
    return 256 if "v5" in kind else 512


def _pick_block_b(B, T, target_rows):
    """Batch rows per grid step so that Bb*T ~ target_rows, with >= 2 grid steps."""
    want = max(1, target_rows // max(T, 1))
    if B >= 2:
        want = min(want, (B + 1) // 2)   # ensure at least 2 grid steps (v7x megacore)
    return max(1, want)


def _const_spec(arr):
    """Full-array BlockSpec with constant index_map, single-buffered when supported."""
    idx = lambda b, _nd=arr.ndim: (0,) * _nd
    buffered = getattr(pl, "Buffered", None)
    if buffered is not None:
        try:
            return pl.BlockSpec(arr.shape, idx, pipeline_mode=buffered(1))
        except TypeError:
            pass
    return pl.BlockSpec(arr.shape, idx)


# --------------------------------------------------------------------------- #
# Kernels
# --------------------------------------------------------------------------- #
def mlp_pool_kernel(x_ref, w1_ref, b1_ref, w2_ref, b2_ref, w3_ref, b3_ref,
                    feat_utt_ref):
    """Frame-level MLP (3x Linear+LeakyReLU) + mean over time for one batch block."""
    Bb, T, Dp = x_ref.shape
    mm = w1_ref.dtype                                   # bf16 for the MXU

    # Collapse (B_blk, T) into one M dimension; feat already arrives as bf16.
    x = x_ref[...].reshape(Bb * T, Dp)

    h = _leaky_relu(jnp.dot(x, w1_ref[...],
                            preferred_element_type=jnp.float32) + b1_ref[...])
    h = _leaky_relu(jnp.dot(h.astype(mm), w2_ref[...],
                            preferred_element_type=jnp.float32) + b2_ref[...])
    h = _leaky_relu(jnp.dot(h.astype(mm), w3_ref[...],
                            preferred_element_type=jnp.float32) + b3_ref[...])   # (M, Dout_p)

    # Utterance-level pooling: mean over the time axis.
    feat_utt = jnp.mean(h.reshape(Bb, T, -1), axis=1)                            # (Bb, Dout_p)
    feat_utt_ref[...] = feat_utt.reshape(Bb, 1, -1)


def classifier_kernel(x_ref, w4_ref, b4_ref, logits_ref):
    """Utterance-level classifier over the whole (padded) batch in one step."""
    logits_ref[...] = (jnp.dot(x_ref[...].astype(w4_ref.dtype), w4_ref[...],
                               preferred_element_type=jnp.float32) + b4_ref[...])


# --------------------------------------------------------------------------- #
# Wrapper
# --------------------------------------------------------------------------- #
def backend_forward(feat, params, *, block_b=None):
    """feat: (B, T, D_in) float32. Returns (logits (B, C), feat_utt (B, D_out))."""
    w1, b1, w2, b2, w3, b3, w4, b4 = params
    B, T, Din = feat.shape
    Dout = w3.shape[1]
    C = w4.shape[1]

    # Lane dims padded to multiples of 128; zero padding is exact (padded lanes stay 0).
    Din_p = _round_up(Din, 128)
    Dout_p = _round_up(Dout, 128)
    C_p = _round_up(C, 128)

    Bb = block_b if block_b is not None else _pick_block_b(B, T, _default_target_rows())
    B_pad = _round_up(B, Bb)
    grid = (B_pad // Bb,)

    wd = jnp.bfloat16
    # Streamed input: pad batch + lanes, cast to bf16 at the boundary (halves DMA bytes).
    feat_p = jnp.pad(feat, ((0, B_pad - B), (0, 0), (0, Din_p - Din))).astype(wd)
    w1p = _pad2(w1, Din_p, Din_p).astype(wd)
    w2p = _pad2(w2, Din_p, Din_p).astype(wd)
    w3p = _pad2(w3, Din_p, Dout_p).astype(wd)
    w4p = _pad2(w4, Dout_p, C_p).astype(wd)
    b1p = _pad2(b1, 1, Din_p)          # biases stay f32
    b2p = _pad2(b2, 1, Din_p)
    b3p = _pad2(b3, 1, Dout_p)
    b4p = _pad2(b4, 1, C_p)

    # Explicit VMEM budget: single-buffered weights + double-buffered feat/out
    # blocks + f32 intermediates, with headroom, capped under the chip's VMEM.
    wbytes = (w1p.size + w2p.size + w3p.size) * 2 + (b1p.size + b2p.size + b3p.size) * 4
    feat_blk = Bb * T * Din_p * 2
    out_blk = Bb * Dout_p * 4
    interm = Bb * T * max(Din_p, Dout_p) * 4
    needed = wbytes + 2 * feat_blk + 2 * out_blk + 4 * interm
    try:
        vmem_cap = getattr(pltpu.get_tpu_info(), "vmem_capacity_bytes", 64 * 2**20)
    except Exception:
        vmem_cap = 64 * 2**20
    vmem_limit = int(min(max(needed * 3 // 2, 32 * 2**20), int(vmem_cap * 0.75)))

    # ---- Frame-level MLP + time pooling ------------------------------------
    feat_utt_p = pl.pallas_call(
        mlp_pool_kernel,
        out_shape=jax.ShapeDtypeStruct((B_pad, 1, Dout_p), jnp.float32),
        grid_spec=pltpu.PrefetchScalarGridSpec(
            num_scalar_prefetch=0,
            grid=grid,
            in_specs=[
                pl.BlockSpec((Bb, T, Din_p), lambda b: (b, 0, 0)),   # streamed feat block
                _const_spec(w1p), _const_spec(b1p),
                _const_spec(w2p), _const_spec(b2p),
                _const_spec(w3p), _const_spec(b3p),
            ],
            out_specs=pl.BlockSpec((Bb, 1, Dout_p), lambda b: (b, 0, 0)),
        ),
        compiler_params=pltpu.CompilerParams(
            dimension_semantics=("parallel",),
            vmem_limit_bytes=vmem_limit),
    )(feat_p, w1p, b1p, w2p, b2p, w3p, b3p)
    feat_utt_p = feat_utt_p.reshape(B_pad, Dout_p)

    # ---- Utterance-level classifier over the whole batch -------------------
    logits_p = pl.pallas_call(
        classifier_kernel,
        out_shape=jax.ShapeDtypeStruct((B_pad, C_p), jnp.float32),
        grid_spec=pltpu.PrefetchScalarGridSpec(
            num_scalar_prefetch=0,
            grid=(1,),
            in_specs=[
                pl.BlockSpec((B_pad, Dout_p), lambda i: (0, 0)),
                pl.BlockSpec((Dout_p, C_p), lambda i: (0, 0)),
                pl.BlockSpec((1, C_p), lambda i: (0, 0)),
            ],
            out_specs=pl.BlockSpec((B_pad, C_p), lambda i: (0, 0)),
        ),
    )(feat_utt_p, w4p, b4p)

    # Strip batch and lane padding.
    return logits_p[:B, :C], feat_utt_p[:B, :Dout]


def init_params(key, in_dim, out_dim, num_classes):
    """Deterministic synthetic weights, stored as (fan_in, fan_out), f32."""
    ks = jax.random.split(key, 8)

    def linear(kw, kb, fan_in, fan_out):
        bound = 1.0 / jnp.sqrt(fan_in)
        w = jax.random.uniform(kw, (fan_in, fan_out), jnp.float32, -bound, bound)
        b = jax.random.uniform(kb, (1, fan_out), jnp.float32, -bound, bound)
        return w, b

    w1, b1 = linear(ks[0], ks[1], in_dim, in_dim)
    w2, b2 = linear(ks[2], ks[3], in_dim, in_dim)
    w3, b3 = linear(ks[4], ks[5], in_dim, out_dim)
    w4, b4 = linear(ks[6], ks[7], out_dim, num_classes)
    return (w1, b1, w2, b2, w3, b3, w4, b4)


if __name__ == "__main__":
    B, T, IN_DIM, OUT_DIM, NUM_CLASSES = 2, 8, 32, 32, 4

    key = jax.random.PRNGKey(0)
    k_feat, k_params = jax.random.split(key)
    feat = jax.random.normal(k_feat, (B, T, IN_DIM), jnp.float32)
    params = init_params(k_params, IN_DIM, OUT_DIM, NUM_CLASSES)

    logits, feat_utt = jax.block_until_ready(backend_forward(feat, params))

    # Pure-JAX reference mimicking the kernel's bf16-matmul / f32-accumulate path.
    w1, b1, w2, b2, w3, b3, w4, b4 = params
    bf = lambda a: a.astype(jnp.bfloat16)
    h = _leaky_relu(jnp.dot(bf(feat), bf(w1), preferred_element_type=jnp.float32) + b1)
    h = _leaky_relu(jnp.dot(bf(h), bf(w2), preferred_element_type=jnp.float32) + b2)
    h = _leaky_relu(jnp.dot(bf(h), bf(w3), preferred_element_type=jnp.float32) + b3)
    ref_utt = h.mean(axis=1)
    ref_logits = jnp.dot(bf(ref_utt), bf(w4), preferred_element_type=jnp.float32) + b4

    assert logits.shape == (B, NUM_CLASSES) and feat_utt.shape == (B, OUT_DIM)
    assert jnp.allclose(feat_utt, ref_utt, atol=1e-2, rtol=1e-2), "feat_utt mismatch"
    assert jnp.allclose(logits, ref_logits, atol=1e-2, rtol=1e-2), "logits mismatch"

    print("KERNEL_OK")
</pallas_src>

<mosaic_0001>
module attributes {stable_mosaic.version = 11 : i64} {
  func.func @mlp_pool_kernel(%arg0: i32, %arg1: memref<1x8x128xbf16, #tpu.memory_space<vmem>>, %arg2: memref<128x128xbf16, #tpu.memory_space<vmem>>, %arg3: memref<1x128xf32, #tpu.memory_space<vmem>>, %arg4: memref<128x128xbf16, #tpu.memory_space<vmem>>, %arg5: memref<1x128xf32, #tpu.memory_space<vmem>>, %arg6: memref<128x128xbf16, #tpu.memory_space<vmem>>, %arg7: memref<1x128xf32, #tpu.memory_space<vmem>>, %arg8: memref<1x1x128xf32, #tpu.memory_space<vmem>>) attributes {dimension_semantics = [#tpu.dimension_semantics<parallel>], iteration_bounds = array<i64: 2>, scalar_prefetch = 0 : i64, scratch_operands = 0 : i64, tpu.core_type = #tpu.core_type<tc>, window_params = [{transform_indices = @transform_0, window_bounds = array<i64: 1, 8, 128>}, {pipeline_mode = #tpu.pipeline_mode<synchronous>, transform_indices = @transform_1, window_bounds = array<i64: 128, 128>}, {pipeline_mode = #tpu.pipeline_mode<synchronous>, transform_indices = @transform_2, window_bounds = array<i64: 1, 128>}, {pipeline_mode = #tpu.pipeline_mode<synchronous>, transform_indices = @transform_3, window_bounds = array<i64: 128, 128>}, {pipeline_mode = #tpu.pipeline_mode<synchronous>, transform_indices = @transform_4, window_bounds = array<i64: 1, 128>}, {pipeline_mode = #tpu.pipeline_mode<synchronous>, transform_indices = @transform_5, window_bounds = array<i64: 128, 128>}, {pipeline_mode = #tpu.pipeline_mode<synchronous>, transform_indices = @transform_6, window_bounds = array<i64: 1, 128>}, {transform_indices = @transform_7, window_bounds = array<i64: 1, 1, 128>}]} {
    %c0 = arith.constant 0 : index
    %c0_0 = arith.constant 0 : index
    %c0_1 = arith.constant 0 : index
    %0 = vector.load %arg1[%c0, %c0_0, %c0_1] : memref<1x8x128xbf16, #tpu.memory_space<vmem>>, vector<1x8x128xbf16>
    %1 = vector.shape_cast %0 : vector<1x8x128xbf16> to vector<8x128xbf16>
    %c0_2 = arith.constant 0 : index
    %c0_3 = arith.constant 0 : index
    %2 = vector.load %arg2[%c0_2, %c0_3] : memref<128x128xbf16, #tpu.memory_space<vmem>>, vector<128x128xbf16>
    %cst = arith.constant dense<0.000000e+00> : vector<8x128xf32>
    %3 = tpu.matmul %1, %2, %cst {dimension_numbers = #tpu.dot_dimension_numbers<[1], [0], [0], [1], [0, 0, 1, 1], [], []>} : vector<8x128xbf16>, vector<128x128xbf16>, vector<8x128xf32> -> vector<8x128xf32>
    %c0_4 = arith.constant 0 : index
    %c0_5 = arith.constant 0 : index
    %4 = vector.load %arg3[%c0_4, %c0_5] : memref<1x128xf32, #tpu.memory_space<vmem>>, vector<1x128xf32>
    %5 = vector.broadcast %4 : vector<1x128xf32> to vector<8x128xf32>
    %6 = arith.addf %3, %5 : vector<8x128xf32>
    %cst_6 = arith.constant 0.00999999977 : f32
    %7 = vector.broadcast %cst_6 : f32 to vector<8x128xf32>
    %8 = arith.mulf %7, %6 : vector<8x128xf32>
    %9 = arith.maximumf %6, %8 : vector<8x128xf32>
    %10 = arith.truncf %9 : vector<8x128xf32> to vector<8x128xbf16>
    %c0_7 = arith.constant 0 : index
    %c0_8 = arith.constant 0 : index
    %11 = vector.load %arg4[%c0_7, %c0_8] : memref<128x128xbf16, #tpu.memory_space<vmem>>, vector<128x128xbf16>
    %cst_9 = arith.constant dense<0.000000e+00> : vector<8x128xf32>
    %12 = tpu.matmul %10, %11, %cst_9 {dimension_numbers = #tpu.dot_dimension_numbers<[1], [0], [0], [1], [0, 0, 1, 1], [], []>} : vector<8x128xbf16>, vector<128x128xbf16>, vector<8x128xf32> -> vector<8x128xf32>
    %c0_10 = arith.constant 0 : index
    %c0_11 = arith.constant 0 : index
    %13 = vector.load %arg5[%c0_10, %c0_11] : memref<1x128xf32, #tpu.memory_space<vmem>>, vector<1x128xf32>
    %14 = vector.broadcast %13 : vector<1x128xf32> to vector<8x128xf32>
    %15 = arith.addf %12, %14 : vector<8x128xf32>
    %cst_12 = arith.constant 0.00999999977 : f32
    %16 = vector.broadcast %cst_12 : f32 to vector<8x128xf32>
    %17 = arith.mulf %16, %15 : vector<8x128xf32>
    %18 = arith.maximumf %15, %17 : vector<8x128xf32>
    %19 = arith.truncf %18 : vector<8x128xf32> to vector<8x128xbf16>
    %c0_13 = arith.constant 0 : index
    %c0_14 = arith.constant 0 : index
    %20 = vector.load %arg6[%c0_13, %c0_14] : memref<128x128xbf16, #tpu.memory_space<vmem>>, vector<128x128xbf16>
    %cst_15 = arith.constant dense<0.000000e+00> : vector<8x128xf32>
    %21 = tpu.matmul %19, %20, %cst_15 {dimension_numbers = #tpu.dot_dimension_numbers<[1], [0], [0], [1], [0, 0, 1, 1], [], []>} : vector<8x128xbf16>, vector<128x128xbf16>, vector<8x128xf32> -> vector<8x128xf32>
    %c0_16 = arith.constant 0 : index
    %c0_17 = arith.constant 0 : index
    %22 = vector.load %arg7[%c0_16, %c0_17] : memref<1x128xf32, #tpu.memory_space<vmem>>, vector<1x128xf32>
    %23 = vector.broadcast %22 : vector<1x128xf32> to vector<8x128xf32>
    %24 = arith.addf %21, %23 : vector<8x128xf32>
    %cst_18 = arith.constant 0.00999999977 : f32
    %25 = vector.broadcast %cst_18 : f32 to vector<8x128xf32>
    %26 = arith.mulf %25, %24 : vector<8x128xf32>
    %27 = arith.maximumf %24, %26 : vector<8x128xf32>
    %28 = vector.shape_cast %27 : vector<8x128xf32> to vector<1x8x128xf32>
    %cst_19 = arith.constant dense<0.000000e+00> : vector<1x128xf32>
    %29 = vector.multi_reduction <add>, %28, %cst_19 [1] : vector<1x8x128xf32> to vector<1x128xf32>
    %cst_20 = arith.constant 8.000000e+00 : f32
    %30 = vector.broadcast %cst_20 : f32 to vector<1x128xf32>
    %31 = arith.divf %29, %30 : vector<1x128xf32>
    %32 = vector.shape_cast %31 : vector<1x128xf32> to vector<1x1x128xf32>
    %c0_21 = arith.constant 0 : index
    %c0_22 = arith.constant 0 : index
    %c0_23 = arith.constant 0 : index
    %33 = vector.load %arg8[%c0_21, %c0_22, %c0_23] : memref<1x1x128xf32, #tpu.memory_space<vmem>>, vector<1x1x128xf32>
    tpu.vector_store %arg8[%c0_21, %c0_22, %c0_23], %32 {strides = array<i32>} : memref<1x1x128xf32, #tpu.memory_space<vmem>>, vector<1x1x128xf32>,
    return
  }
  func.func @transform_0(%arg0: i32) -> (i32, i32, i32) {
    %c0_i32 = arith.constant 0 : i32
    %c0_i32_0 = arith.constant 0 : i32
    %c0_i32_1 = arith.constant 0 : i32
    return %arg0, %c0_i32, %c0_i32_0 : i32, i32, i32
  }
  func.func @transform_1(%arg0: i32) -> (i32, i32) {
    %c0_i32 = arith.constant 0 : i32
    %c0_i32_0 = arith.constant 0 : i32
    %c0_i32_1 = arith.constant 0 : i32
    return %c0_i32, %c0_i32_0 : i32, i32
  }
  func.func @transform_2(%arg0: i32) -> (i32, i32) {
    %c0_i32 = arith.constant 0 : i32
    %c0_i32_0 = arith.constant 0 : i32
    %c0_i32_1 = arith.constant 0 : i32
    return %c0_i32, %c0_i32_0 : i32, i32
  }
  func.func @transform_3(%arg0: i32) -> (i32, i32) {
    %c0_i32 = arith.constant 0 : i32
    %c0_i32_0 = arith.constant 0 : i32
    %c0_i32_1 = arith.constant 0 : i32
    return %c0_i32, %c0_i32_0 : i32, i32
  }
  func.func @transform_4(%arg0: i32) -> (i32, i32) {
    %c0_i32 = arith.constant 0 : i32
    %c0_i32_0 = arith.constant 0 : i32
    %c0_i32_1 = arith.constant 0 : i32
    return %c0_i32, %c0_i32_0 : i32, i32
  }
  func.func @transform_5(%arg0: i32) -> (i32, i32) {
    %c0_i32 = arith.constant 0 : i32
    %c0_i32_0 = arith.constant 0 : i32
    %c0_i32_1 = arith.constant 0 : i32
    return %c0_i32, %c0_i32_0 : i32, i32
  }
  func.func @transform_6(%arg0: i32) -> (i32, i32) {
    %c0_i32 = arith.constant 0 : i32
    %c0_i32_0 = arith.constant 0 : i32
    %c0_i32_1 = arith.constant 0 : i32
    return %c0_i32, %c0_i32_0 : i32, i32
  }
  func.func @transform_7(%arg0: i32) -> (i32, i32, i32) {
    %c0_i32 = arith.constant 0 : i32
    %c0_i32_0 = arith.constant 0 : i32
    %c0_i32_1 = arith.constant 0 : i32
    return %arg0, %c0_i32, %c0_i32_0 : i32, i32, i32
  }
}

</mosaic_0001>

<bundles_post_ra>
// kernel: tpu_custom_call.1
= control target key start
LH: loop header
LB: loop body
LE: loop exit
PB: predicated region body
PF: predicated region fallthrough
CT: control target
= control target key end

     0   :  { %12 = vsyncpa [#allocation3], 0  ;;  %s1577_s0 = inlined_call_operand.hbm [shape: bf16[2,8,128], index: 0, kind: input, shape index: {}]   ;;  %s1578_s1 = inlined_call_operand.hbm [shape: bf16[128,128], index: 1, kind: input, shape index: {}]   ;;  %s1579_s2 = inlined_call_operand.vmem [shape: f32[1,128], index: 2, kind: input, shape index: {}]   ;;  %s1580_s3 = inlined_call_operand.hbm [shape: bf16[128,128], index: 3, kind: input, shape index: {}]   ;;  %s1581_s4 = inlined_call_operand.vmem [shape: f32[1,128], index: 4, kind: input, shape index: {}]   ;;  %s1582_s5 = inlined_call_operand.hbm [shape: bf16[128,128], index: 5, kind: input, shape index: {}]   ;;  %s1583_s6 = inlined_call_operand.vmem [shape: f32[1,128], index: 6, kind: input, shape index: {}]   ;;  %s1584_s7 = inlined_call_operand.hbm [shape: f32[2,1,128], index: 7, kind: output, shape index: {}]  }
   0x1   :  { %14 = vsyncpa [#allocation3 + $0x1], 0 }
   0x2   :  { %15 = vsyncpa [#allocation6], 0 }
   0x3   :  { %16 = vsyncpa [#allocation9], 0 }
   0x4   :  { %17 = vsyncpa [#allocation4], 0 }
   0x5   :  { %19 = vsyncpa [#allocation4 + $0x1], 0  ;;  %s1271_s24 = smov 0   ;;  %s1273_s25 = smov 0  }
   0x6   :  { %s1275_s26 = smov 0   ;;  %s1277_s27 = smov 0  }
   0x7 LB: > { %s1292_s28 = sadd.s32 4294967295, %s1220_s27   ;;  %s797_s29 = sadd.s32 4294967294, %s1220_s27   ;;  %s1220_s27 = sphi %s1277_s27, %s1610_s27   ;;  %s1216_s26 = sphi %s1275_s26, %s1609_s26   ;;  %s1212_s25 = sphi %s1273_s25, %s1608_s25   ;;  %s1208_s24 = sphi %s1271_s24, %s1607_s24  }
   0x8   : > { %p45_p0 = scmp.ne.s32.totalorder %s1212_s25, %s1208_s24  ;;  %p1585_p1 = scmp.eq.s32.totalorder %s1292_s28, 0 }
   0x9   : > { %p201_p3 = scmp.eq.s32.totalorder %s797_s29, 1  ;;  %p798_p5 = scmp.ge.s32.totalorder %s1220_s27, 1 }
   0xa   : > { %p1301_p4 = por %p1585_p1, %p45_p0  ;;  %p208_p7 = scmp.lt.s32.totalorder %s1220_s27, 3 }
   0xb   : > { %p1306_p6 = por %p201_p3, %p45_p0  ;;  %s1222_s10 = smov [#allocation5]  }
   0xc   : > { %s1589_s30 = scalar_select %p1301_p4, 1, 0 }
   0xd   : > { %s1590_s8 = scalar_select %p1306_p6, 1, 0 }
   0xe   : > { %p1311_p8 = pnand %p798_p5, %p208_p7  ;;  %s220_s11 = sshll.u32 %s1222_s10, 4  ;;  %s1315_s11 = int_to_ptr.vmem [resolvable:$true] %s220_s11 }
   0xf   : > { %1591 = sst [smem:[#allocation15_spill]] %s1590_s8  ;;  %s1223_s13 = smov [#allocation7]  }
  0x10   : > { %s1592_s9 = scalar_select %p1311_p8, 1, 0 }
  0x11   : > { %p943_p9 = pneg %p1311_p8  ;;  %s236_s14 = sshll.u32 %s1223_s13, 4  ;;  %s1326_s14 = int_to_ptr.vmem [resolvable:$true] %s236_s14 }
  0x12   : > { %s1224_s15 = smov [#allocation8]   ;;  %s1032_s19 = scalar_lea.hbm %s1578_s1, 1024 }
  0x13   : > { %p1322_p11 = pnand %p943_p9, %p1585_p1  ;;  %s1328_s16 = sshll.u32 %s1224_s15, 4  ;;  %s253_s16 = int_to_ptr.vmem [resolvable:$true] %s1328_s16 }
  0x14   : > { %p1033_p12 = scmp.ne.s32.totalorder %s1578_s1, %s1032_s19  ;;  %p1039_p5 = scmp.lt.u32.totalorder %s1032_s19, %s1578_s1 }
  0x15   : > { %p1338_p13 = pneg %p1322_p11 }
  0x17   : > { %p1035_p0 = pnand %p1338_p13, %p1033_p12 }
  0x19   : > { %p1036_p3 = pneg %p1035_p0 }
  0x1b   : > { %p1041_p7 = pnand %p1039_p5, %p1036_p3 }
  0x1d   : > { %1044 = shalt.err (!%p1041_p7)
}
  0x1e   : > { %s1045_s10 = scalar_lea.vmem %s1315_s11, 1024  ;;  %p1053_p2 = scmp.lt.s32.totalorder %s1315_s11, %s1315_s11 }
  0x1f   : > { %p1046_p9 = scmp.ne.s32.totalorder %s1315_s11, %s1045_s10  ;;  %p1054_p6 = scmp.lt.s32.totalorder %s1045_s10, %s1045_s10 }
  0x21   : > { %p1048_p10 = pnand %p1046_p9, %p1338_p13  ;;  %p1055_p12 = por %p1054_p6, %p1053_p2 }
  0x23   : > { %p1049_p1 = pneg %p1048_p10 }
  0x25   : > { %p1056_p0 = pnand %p1055_p12, %p1049_p1 }
  0x27   : > { %1059 = shalt.err (!%p1056_p0)
}
  0x28   : > { %s1225_s13 = smov 64   ;;  %s1226_s15 = smov 4  }
  0x29   : > { %946 = dma.hbm_to_vmem [thread:$0]  (!%p1322_p11), %s1578_s1, 1024, %s1315_s11, [#allocation6], %s1225_s13, %s1225_s13, %s1226_s15  }
  0x2a   : > { %s1060_s21 = scalar_lea.hbm %s1580_s3, 1024 }
  0x2b   : > { %p1061_p1 = scmp.ne.s32.totalorder %s1580_s3, %s1060_s21  ;;  %p1067_p10 = scmp.lt.u32.totalorder %s1060_s21, %s1580_s3 }
  0x2d   : > { %p1063_p2 = pnand %p1061_p1, %p1338_p13 }
  0x2f   : > { %p1064_p6 = pneg %p1063_p2 }
  0x31   : > { %p1069_p3 = pnand %p1067_p10, %p1064_p6 }
  0x33   : > { %1072 = shalt.err (!%p1069_p3)
}
  0x34   : > { %s1073_s11 = scalar_lea.vmem %s1326_s14, 1024  ;;  %p1081_p12 = scmp.lt.s32.totalorder %s1326_s14, %s1326_s14 }
  0x35   : > { %p1074_p5 = scmp.ne.s32.totalorder %s1326_s14, %s1073_s11  ;;  %p1082_p0 = scmp.lt.s32.totalorder %s1073_s11, %s1073_s11 }
  0x37   : > { %p1076_p7 = pnand %p1074_p5, %p1338_p13  ;;  %p1083_p1 = por %p1082_p0, %p1081_p12 }
  0x39   : > { %p1077_p9 = pneg %p1076_p7 }
  0x3b   : > { %p1084_p2 = pnand %p1083_p1, %p1077_p9 }
  0x3d   : > { %1087 = shalt.err (!%p1084_p2)
}
  0x3e   : > { %949 = dma.hbm_to_vmem [thread:$0]  (!%p1322_p11), %s1580_s3, 1024, %s1326_s14, [#allocation6], %s1225_s13, %s1225_s13, %s1226_s15  }
  0x3f   : > { %s1088_s20 = scalar_lea.hbm %s1582_s5, 1024 }
  0x40   : > { %p1089_p6 = scmp.ne.s32.totalorder %s1582_s5, %s1088_s20  ;;  %p1095_p5 = scmp.lt.u32.totalorder %s1088_s20, %s1582_s5 }
  0x42   : > { %p1091_p10 = pnand %p1089_p6, %p1338_p13 }
  0x44   : > { %p1092_p3 = pneg %p1091_p10 }
  0x46   : > { %p1097_p7 = pnand %p1095_p5, %p1092_p3 }
  0x48   : > { %1100 = shalt.err (!%p1097_p7)
}
  0x49   : > { %s1101_s11 = scalar_lea.vmem %s253_s16, 1024  ;;  %p1109_p1 = scmp.lt.s32.totalorder %s253_s16, %s253_s16 }
  0x4a   : > { %p1102_p9 = scmp.ne.s32.totalorder %s253_s16, %s1101_s11  ;;  %p1110_p2 = scmp.lt.s32.totalorder %s1101_s11, %s1101_s11 }
  0x4c   : > { %p1104_p12 = pnand %p1102_p9, %p1338_p13  ;;  %p1111_p4 = por %p1110_p2, %p1109_p1 }
  0x4e   : > { %p1105_p0 = pneg %p1104_p12 }
  0x50   : > { %p1112_p8 = pnand %p1111_p4, %p1105_p0 }
  0x52   : > { %1115 = shalt.err (!%p1112_p8)
}
  0x53   : > { %952 = dma.hbm_to_vmem [thread:$0]  (!%p1322_p11), %s1582_s5, 1024, %s253_s16, [#allocation9], %s1225_s13, %s1225_s13, %s1226_s15  }
  0x54   : > { %s1411_s22 = sadd.s32 1, %s1220_s27   ;;  %s32_s17 = sadd.s32 1, %s1216_s26 }
  0x55   : > { %s29_s12 = ssub.s32 %s1220_s27, %s1411_s22  ;;  %p39_p8 = scmp.ne.s32.totalorder %s1216_s26, %s1212_s25 }
  0x56   : > { %p30_p4 = scmp.eq.s32.totalorder %s29_s12, 0  ;;  %p40_p13 = scmp.eq.s32.totalorder %s1220_s27, 0 }
  0x57   : > { %p964_p6 = scmp.lt.s32.totalorder %s1220_s27, 2  ;;  %p1595_p3 = scmp.eq.s32.totalorder %s1292_s28, 1 }
  0x58   : > { %s1421_s18 = scalar_select %p30_p4, %s1216_s26, %s32_s17  }
  0x59   : > { %p41_p10 = por %p40_p13, %p39_p8  ;;  %p1425_p5 = por %p1595_p3, %p39_p8 }
  0x5a   : > { %s269_s20 = sand.u32 1, %s1216_s26   ;;  %s804_s21 = sshll.u32 %s1220_s27, 6 }
  0x5b   : > { %s803_s16 = sshll.u32 %s269_s20, 2  ;;  %s1434_s23 = scalar_lea.hbm %s1577_s0, %s804_s21 }
  0x5c   : > { %s273_s29 = scalar_lea.vmem [#allocation2], %s803_s16  ;;  %p1436_p11 = pnand %p964_p6, %p41_p10 }
  0x5d   : > { %s280_s10 = sshll.u32 %s273_s29, 4  ;;  %s270_s14 = scalar_lea.sflag [#allocation3], %s269_s20  ;;  %s1440_s10 = int_to_ptr.vmem [resolvable:$true] %s280_s10 }
  0x5e   : > { %s1116_s8 = scalar_lea.hbm %s1434_s23, 64  ;;  %p1118_p9 = pneg %p1436_p11 }
  0x5f   : > { %p1117_p7 = scmp.ne.s32.totalorder %s1434_s23, %s1116_s8  ;;  %s1121_s21 = scalar_lea.hbm %s1577_s0, 128 }
  0x60   : > { %p1122_p1 = scmp.lt.u32.totalorder %s1434_s23, %s1577_s0  ;;  %p1123_p2 = scmp.lt.u32.totalorder %s1121_s21, %s1116_s8 }
  0x61   : > { %p1119_p12 = pnand %p1118_p9, %p1117_p7  ;;  %p1125_p8 = scmp.lt.u32.totalorder %s1116_s8, %s1434_s23 }
  0x62   : > { %p1124_p4 = por %p1123_p2, %p1122_p1 }
  0x63   : > { %p1120_p0 = pneg %p1119_p12 }
  0x64   : > { %p1126_p13 = por %p1125_p8, %p1124_p4 }
  0x66   : > { %p1127_p6 = pnand %p1126_p13, %p1120_p0 }
  0x68   : > { %1130 = shalt.err (!%p1127_p6)
}
  0x69   : > { %s1131_s20 = scalar_lea.vmem %s1440_s10, 64  ;;  %s1227_s15 = smov [#allocation2]  }
  0x6a   : > { %p1132_p10 = scmp.ne.s32.totalorder %s1440_s10, %s1131_s20  ;;  %s1136_s29 = sshll.u32 %s1227_s15, 4  ;;  %s1137_s29 = int_to_ptr.vmem [resolvable:$false] %s1136_s29 }
  0x6b   : > { %s1138_s12 = scalar_lea.vmem %s1137_s29, 128  ;;  %p1139_p12 = scmp.lt.s32.totalorder %s1440_s10, %s1137_s29 }
  0x6c   : > { %p1134_p3 = pnand %p1132_p10, %p1118_p9  ;;  %p1140_p1 = scmp.lt.s32.totalorder %s1138_s12, %s1131_s20 }
  0x6e   : > { %p1135_p7 = pneg %p1134_p3  ;;  %p1141_p2 = por %p1140_p1, %p1139_p12 }
  0x70   : > { %p1142_p4 = pnand %p1141_p2, %p1135_p7 }
  0x72   : > { %1145 = shalt.err (!%p1142_p4)
}
  0x73   : > { %956 = dma.hbm_to_vmem [thread:$0]  (!%p1436_p11), %s1434_s23, 64, %s1440_s10, %s270_s14  }
  0x74   : > { %p1598_p0 = scmp.ne.s32.totalorder %s1592_s9, 0 }
  0x75   : > { %s1470_s8 = sand.u32 (!%p1598_p0), 1, %s1212_s25   ;;  %p1599_p9 = scmp.ne.s32.totalorder (!%p1598_p0), %s1589_s30, 0 }
  0x76   : > { %289 = sbr.rel (%p1598_p0) target bundleno = 853 (0x355), region = 48  ;;  %s806_s17 = sshll.u32 (!%p1598_p0), %s1470_s8, 2 }
  0x77   : > { %s292_s21 = scalar_lea.sflag (!%p1598_p0), [#allocation3], %s1470_s8  ;;  %s1474_s16 = scalar_lea.vmem (!%p1598_p0), [#allocation2], %s806_s17 }
  0x7d   : > { %1191 = dma.done.wait (%p1599_p9), %s292_s21, 64  }
  0x7e   : > { %1193 = vsyncadd (%p1599_p9), %s292_s21, 4294967232  ;;  %p1600_p11 = scmp.eq.s32.totalorder %s1292_s28, 0 }
  0x80   : > { %1195 = dma.done.wait (%p1600_p11), [#allocation6], 2048   ;;  %p1601_p8 = pmov %p1600_p11 }
  0x82   : > { %1197 = vsyncadd (%p1601_p8), [#allocation6], 4294965248  ;;  %p1602_p13 = pmov %p1601_p8 }
  0x83   : > { %p1603_p6 = pmov %p1601_p8 }
  0x84   : > { %1199 = dma.done.wait (%p1602_p13), [#allocation9], 1024  }
  0x85   : > { %1201 = vsyncadd (%p1603_p6), [#allocation9], 4294966272  ;;  %v1228_v0 = vmov 0.0   ;;  %vm1229_vm0 = vmmov 0   ;;  %v1008_v1 = vld [vmem:[#allocation5] sm:$0xff]   ;;  %v1009_v2 = vld [vmem:[#allocation5 + $0x8] sm:$0xff]  }
  0x86   : > { %867 = vmatprep.subr.bf16.mxu0 %v1228_v0  ;;  %883 = vmatprep.mubr.msk.bf16.mxu0 %vm1229_vm0, %v1228_v0  ;;  %v1010_v3 = vld [vmem:[#allocation5 + $0x10] sm:$0xff]   ;;  %v1016_v4 = vld [vmem:[#allocation7] sm:$0xff]   ;;  %v1011_v5 = vld [vmem:[#allocation5 + $0x18] sm:$0xff]   ;;  %s837_s13 = sshll.u32 %s1292_s28, 4  ;;  %s336_s20 = scalar_lea.vmem [#allocation10], %s1470_s8 }
  0x87   : > { %887 = vmatprep.subr.bf16.mxu1 %v1228_v0  ;;  %903 = vmatprep.mubr.msk.bf16.mxu1 %vm1229_vm0, %v1228_v0  ;;  %v1017_v6 = vld [vmem:[#allocation7 + $0x8] sm:$0xff]   ;;  %v1012_v7 = vld [vmem:[#allocation5 + $0x20] sm:$0xff]   ;;  %v1018_v8 = vld [vmem:[#allocation7 + $0x10] sm:$0xff]   ;;  %s702_s15 = sshll.u32 %s336_s20, 4  ;;  %s1533_s17 = scalar_lea.hbm %s1584_s7, %s837_s13  ;;  %s1535_s15 = int_to_ptr.vmem [resolvable:$true] %s702_s15 }
  0x88   : > { %868 = vmatpush3.bf16.msra.mxu0 %v1008_v1  ;;  %888 = vmatpush3.bf16.msra.mxu1 %v1016_v4  ;;  %v1013_v9 = vld [vmem:[#allocation5 + $0x28] sm:$0xff]   ;;  %v1019_v10 = vld [vmem:[#allocation7 + $0x18] sm:$0xff]   ;;  %v1014_v11 = vld [vmem:[#allocation5 + $0x30] sm:$0xff]   ;;  %s690_s21 = scalar_lea.sflag [#allocation4], %s1470_s8  ;;  %s1230_s28 = smov [#allocation10]  }
  0x89   : > { %869 = vmatprep.subr.bf16.mxu0 %v1228_v0  ;;  %889 = vmatprep.subr.bf16.mxu1 %v1228_v0  ;;  %v1020_v12 = vld [vmem:[#allocation7 + $0x20] sm:$0xff]   ;;  %v1015_v13 = vld [vmem:[#allocation5 + $0x38] sm:$0xff]   ;;  %v1021_v14 = vld [vmem:[#allocation7 + $0x28] sm:$0xff]   ;;  %s1150_s30 = sshll.u32 %s1230_s28, 4  ;;  %s1151_s30 = int_to_ptr.vmem [resolvable:$false] %s1150_s30 }
  0x8a   : > { %v338_v15 = vld [vmem:[%s1474_s16] sm:$0xf]  ;;  %v1022_v16 = vld [vmem:[#allocation7 + $0x30] sm:$0xff]   ;;  %v1024_v18 = vld [vmem:[#allocation8] sm:$0xff]   ;;  %s1146_s16 = scalar_lea.vmem %s1535_s15, 16  ;;  %s1152_s9 = scalar_lea.vmem %s1151_s30, 32 }
  0x8b   : > { %v1023_v17 = vld [vmem:[#allocation7 + $0x38] sm:$0xff]   ;;  %v1025_v19 = vld [vmem:[#allocation8 + $0x8] sm:$0xff]   ;;  %v1026_v20 = vld [vmem:[#allocation8 + $0x10] sm:$0xff]   ;;  %p1147_p10 = scmp.ne.s32.totalorder %s1535_s15, %s1146_s16  ;;  %p1153_p12 = scmp.lt.s32.totalorder %s1535_s15, %s1151_s30 }
  0x8c   : > { %870 = vmatpush3.bf16.msra.mxu0 %v1009_v2  ;;  %890 = vmatpush3.bf16.msra.mxu1 %v1017_v6  ;;  %v1027_v21 = vld [vmem:[#allocation8 + $0x18] sm:$0xff]   ;;  %v1028_v22 = vld [vmem:[#allocation8 + $0x20] sm:$0xff]   ;;  %v1029_v23 = vld [vmem:[#allocation8 + $0x28] sm:$0xff]   ;;  %p1154_p1 = scmp.lt.s32.totalorder %s1152_s9, %s1146_s16 }
  0x8d   : > { %871 = vmatprep.subr.bf16.mxu0 %v1228_v0  ;;  %891 = vmatprep.subr.bf16.mxu1 %v1228_v0  ;;  %v810_v24 = vld [vmem:[%s1579_s2] ss:$0 sm:$0xff]  ;;  %v1030_v33 = vld [vmem:[#allocation8 + $0x30] sm:$0xff]   ;;  %p1148_p3 = pnand %p1147_p10, %p1425_p5 }
  0x8e   : > { %v1031_v34 = vld [vmem:[#allocation8 + $0x38] sm:$0xff]   ;;  %p1155_p2 = por %p1154_p1, %p1153_p12 }
  0x8f   : > { %v819_v35 = vld [vmem:[%s1581_s4] ss:$0 sm:$0xff]  ;;  %p1149_p7 = pneg %p1148_p3 }
  0x90   : > { %872 = vmatpush3.bf16.msra.mxu0 %v1010_v3  ;;  %892 = vmatpush3.bf16.msra.mxu1 %v1018_v8  ;;  %v828_v44 = vld [vmem:[%s1583_s6] ss:$0 sm:$0xff] }
  0x91   : > { %873 = vmatprep.subr.bf16.mxu0 %v1228_v0  ;;  %893 = vmatprep.subr.bf16.mxu1 %v1228_v0  ;;  %p1156_p4 = pnand %p1155_p2, %p1149_p7 }
  0x94   : > { %874 = vmatpush3.bf16.msra.mxu0 %v1011_v5  ;;  %894 = vmatpush3.bf16.msra.mxu1 %v1019_v10 }
  0x95   : > { %875 = vmatprep.subr.bf16.mxu0 %v1228_v0  ;;  %895 = vmatprep.subr.bf16.mxu1 %v1228_v0 }
  0x98   : > { %876 = vmatpush3.bf16.msra.mxu0 %v1012_v7  ;;  %896 = vmatpush3.bf16.msra.mxu1 %v1020_v12 }
  0x99   : > { %877 = vmatprep.subr.bf16.mxu0 %v1228_v0  ;;  %897 = vmatprep.subr.bf16.mxu1 %v1228_v0 }
  0x9c   : > { %878 = vmatpush3.bf16.msra.mxu0 %v1013_v9  ;;  %898 = vmatpush3.bf16.msra.mxu1 %v1021_v14 }
  0x9d   : > { %879 = vmatprep.subr.bf16.mxu0 %v1228_v0  ;;  %899 = vmatprep.subr.bf16.mxu1 %v1228_v0 }
  0xa0   : > { %880 = vmatpush3.bf16.msra.mxu0 %v1014_v11  ;;  %900 = vmatpush3.bf16.msra.mxu1 %v1022_v16 }
  0xa1   : > { %881 = vmatprep.subr.bf16.mxu0 %v1228_v0  ;;  %901 = vmatprep.subr.bf16.mxu1 %v1228_v0 }
  0xa4   : > { %882 = vmatpush3.bf16.msra.mxu0 %v1015_v13  ;;  %902 = vmatpush3.bf16.msra.mxu1 %v1023_v17 }
  0xa5   : > { %907 = vmatprep.subr.bf16.mxu0 %v1228_v0 }
  0xa7   : > { %884 = vmatmul.mubr.bf16.vlgmr.msra.gmra.mrb[0].mxu0 %v338_v15 }
  0xa8   : > { %923 = vmatprep.mubr.msk.bf16.mxu0 %vm1229_vm0, %v1228_v0  ;;  %908 = vmatpush3.bf16.msra.mxu0 %v1024_v18 }
  0xa9   : > { %909 = vmatprep.subr.bf16.mxu0 %v1228_v0 }
  0xac   : > { %910 = vmatpush3.bf16.msra.mxu0 %v1025_v19 }
  0xad   : > { %911 = vmatprep.subr.bf16.mxu0 %v1228_v0 }
  0xb0   : > { %912 = vmatpush3.bf16.msra.mxu0 %v1026_v20 }
  0xb1   : > { %913 = vmatprep.subr.bf16.mxu0 %v1228_v0 }
  0xb4   : > { %914 = vmatpush3.bf16.msra.mxu0 %v1027_v21 }
  0xb5   : > { %915 = vmatprep.subr.bf16.mxu0 %v1228_v0 }
  0xb8   : > { %916 = vmatpush3.bf16.msra.mxu0 %v1028_v22 }
  0xb9   : > { %917 = vmatprep.subr.bf16.mxu0 %v1228_v0 }
  0xbc   : > { %918 = vmatpush3.bf16.msra.mxu0 %v1029_v23 }
  0xbd   : > { %919 = vmatprep.subr.bf16.mxu0 %v1228_v0 }
  0xc0   : > { %920 = vmatpush3.bf16.msra.mxu0 %v1030_v33 }
  0xc1   : > { %921 = vmatprep.subr.bf16.mxu0 %v1228_v0 }
  0xc4   : > { %922 = vmatpush3.bf16.msra.mxu0 %v1031_v34 }
 0x17a   : > { %v444_v25 = vpop.f32.mrb[0].mxu0 }
 0x17b   : > { %v445_v26 = vadd.f32 %v810_v24, %v444_v25  ;;  %v885_v27 = vpop.f32.mrb[1].mxu0 }
 0x17c   : > { %v447_v28 = vpop.f32.mrb[2].mxu0 }
 0x17d   : > { %v450_v29 = vmul.f32 0.01, %v445_v26  ;;  %v886_v30 = vpop.f32.mrb[3].mxu0 }
 0x17f   : > { %v451_v31 = vmax.f32 %v445_v26, %v450_v29 }
 0x181   : > { %v452_v32 = vpack.c.bf16 %v451_v31, %v451_v31 }
 0x183   : > { %904 = vmatmul.mubr.bf16.vlgmr.msra.gmra.mrb[0].mxu1 %v452_v32 }
 0x256   : > { %v558_v36 = vpop.f32.mrb[0].mxu1 }
 0x257   : > { %v559_v37 = vadd.f32 %v819_v35, %v558_v36  ;;  %v905_v38 = vpop.f32.mrb[1].mxu1 }
 0x258   : > { %v561_v39 = vpop.f32.mrb[2].mxu1 }
 0x259   : > { %v564_v40 = vmul.f32 0.01, %v559_v37  ;;  %v906_v41 = vpop.f32.mrb[3].mxu1 }
 0x25b   : > { %v565_v42 = vmax.f32 %v559_v37, %v564_v40 }
 0x25d   : > { %v566_v43 = vpack.c.bf16 %v565_v42, %v565_v42 }
 0x25f   : > { %924 = vmatmul.mubr.bf16.vlgmr.msra.gmra.mrb[4].mxu0 %v566_v43 }
 0x332   : > { %v672_v45 = vpop.f32.mrb[4].mxu0 }
 0x333   : > { %v673_v46 = vadd.f32 %v828_v44, %v672_v45  ;;  %v925_v47 = vpop.f32.mrb[5].mxu0 }
 0x334   : > { %v675_v48 = vpop.f32.mrb[6].mxu0 }
 0x335   : > { %v678_v49 = vmul.f32 0.01, %v673_v46  ;;  %v926_v50 = vpop.f32.mrb[7].mxu0 }
 0x337   : > { %v679_v51 = vmax.f32 %v673_v46, %v678_v49 }
 0x339   : > { %v680_v52 = vrot.slane %v679_v51, 4 }
 0x33b   : > { %v681_v53 = vadd.f32 %v680_v52, %v679_v51 }
 0x33d   : > { %v682_v54 = vrot.slane %v681_v53, 2 }
 0x33f   : > { %v683_v55 = vadd.f32 %v682_v54, %v681_v53 }
 0x341   : > { %v684_v56 = vrot.slane %v683_v55, 1 }
 0x343   : > { %v685_v57 = vadd.f32 %v684_v56, %v683_v55 }
 0x345   : > { %v687_v58 = vmul.f32 0.125, %v685_v57 }
 0x347   : > { %688 = vst [vmem:[%s336_s20] sm:$0x1] %v687_v58 }
 0x348   : > { %1159 = shalt.err (!%p1156_p4)
}
 0x349   : > { %s1160_s8 = scalar_lea.hbm %s1533_s17, 16  ;;  %s1164_s11 = scalar_lea.hbm %s1584_s7, 32 }
 0x34a   : > { %p1161_p0 = scmp.ne.s32.totalorder %s1533_s17, %s1160_s8  ;;  %p1165_p8 = scmp.lt.u32.totalorder %s1533_s17, %s1584_s7 }
 0x34b   : > { %p1166_p13 = scmp.lt.u32.totalorder %s1164_s11, %s1160_s8  ;;  %p1168_p10 = scmp.lt.u32.totalorder %s1160_s8, %s1533_s17 }
 0x34c   : > { %p1162_p9 = pnand %p1161_p0, %p1425_p5 }
 0x34d   : > { %p1167_p6 = por %p1166_p13, %p1165_p8 }
 0x34e   : > { %p1163_p11 = pneg %p1162_p9 }
 0x34f   : > { %p1169_p3 = por %p1168_p10, %p1167_p6 }
 0x351   : > { %p1170_p7 = pnand %p1169_p3, %p1163_p11 }
 0x353   : > { %1173 = shalt.err (!%p1170_p7)
}
 0x354   : > { %941 = dma.vmem_to_hbm [thread:$0]  (%p1425_p5), %s1535_s15, 16, %s1533_s17, %s690_s21  }
 0x355 PF: > { %s1604_s20 = sld [smem:[#allocation15_spill]]  ;;  %s714_s29 = sand.u32 1, %s1208_s24  }
 0x356   : > { %p1606_p1 = scmp.ge.s32.totalorder %s1220_s27, 2  ;;  %s715_s12 = scalar_lea.sflag [#allocation4], %s714_s29 }
 0x35b   : > { %p1605_p12 = scmp.ne.s32.totalorder %s1604_s20, 0 }
 0x35d   : > { %p958_p2 = pnand %p1606_p1, %p1605_p12 }
 0x35f   : > { %1203 = dma.done.wait (!%p958_p2), %s715_s12, 16  }
 0x360   : > { %1205 = vsyncadd (!%p958_p2), %s715_s12, 4294967280  ;;  %p22_p4 = scmp.ge.s32.totalorder %s1411_s22, 4   ;;  %s1607_s24 = smov %s1212_s25 }
 0x361   : > { %s1608_s25 = smov %s1216_s26  ;;  %s1609_s26 = smov %s1421_s18 }
 0x362   : > { %s1610_s27 = smov %s1411_s22  ;;  %24 = sbr.rel (!%p22_p4) target bundleno = 7 (0x7), region = 105 }
 0x369   :  { %719 = vsyncpa [#allocation3], 1 }
 0x36a   :  { %721 = vsyncpa [#allocation3 + $0x1], 1 }
 0x36b   :  { %722 = vsyncpa [#allocation6], 1 }
 0x36c   :  { %723 = vsyncpa [#allocation9], 1 }
 0x36d   :  { %724 = vsyncpa [#allocation4], 1 }
 0x36e   :  { %726 = vsyncpa [#allocation4 + $0x1], 1 }

</bundles_post_ra>
